<compile_context>
chip_gen: v6e
topology: v6e:2x2x1
jax: 0.10.0
libtpu: 0.0.40
codegen_flags: <defaults>
</compile_context>

<pallas_src>
import functools

import jax
import jax.numpy as jnp
from jax.experimental import pallas as pl
from jax.experimental.pallas import tpu as pltpu


def actor_mlp_kernel(x_ref, w1_ref, b1_ref, w234_ref, b234_ref, o_ref, *, hid):
    """Fused 4-layer MLP: relu(relu(relu(x@W1+b1)@W2+b2)@W3+b3)@W4+b4.

    Layer 1 is a pure f32 dot (K is tiny, keeps observation precision).
    Layers 2-4 use bf16 dot inputs with f32 accumulation; bias-add / ReLU in f32.
    Layers 2-4 weights/biases live in one resident block, sliced statically.
    """
    # Layer 1: f32 x f32, K = in_features (8) -> negligible MXU cost.
    h = jnp.dot(x_ref[...], w1_ref[...],
                preferred_element_type=jnp.float32) + b1_ref[...]
    h = jnp.maximum(h, 0.0).astype(jnp.bfloat16)

    # Layer 2.
    h = jnp.dot(h, w234_ref[:, 0:hid],
                preferred_element_type=jnp.float32) + b234_ref[:, 0:hid]
    h = jnp.maximum(h, 0.0).astype(jnp.bfloat16)

    # Layer 3.
    h = jnp.dot(h, w234_ref[:, hid:2 * hid],
                preferred_element_type=jnp.float32) + b234_ref[:, hid:2 * hid]
    h = jnp.maximum(h, 0.0).astype(jnp.bfloat16)

    # Layer 4 (output head, padded to 128 lanes for an unmasked store).
    out = jnp.dot(h, w234_ref[:, 2 * hid:],
                  preferred_element_type=jnp.float32) + b234_ref[:, 2 * hid:]
    o_ref[...] = out


def _tensorcores_per_chip():
    """Best-effort TensorCores-per-chip detection (v7x / megacore chips = 2)."""
    try:
        kind = jax.devices()[0].device_kind.lower()
        if "v7" in kind or "tpu7" in kind or "v4" in kind or "v5p" in kind:
            return 2
    except Exception:
        pass
    return 1


def _choose_batch_tile(batch, num_tc, max_tile_b):
    """One tile per TensorCore when possible, capped at max_tile_b rows."""
    b8 = ((batch + 7) // 8) * 8                 # sublane-align the batch
    per_tc = pl.cdiv(b8, num_tc)
    tile_b = min(max_tile_b, ((per_tc + 7) // 8) * 8)
    num_tiles = pl.cdiv(b8, tile_b)
    b_pad = num_tiles * tile_b
    return tile_b, num_tiles, b_pad


@functools.partial(jax.jit, static_argnames=("n_actions", "max_tile_b"))
def actor_forward(x, params, n_actions, max_tile_b=1024):
    """x: (B, in_features) f32. Returns (B, n_actions) f32 logits."""
    B, in_features = x.shape
    hid = params["w1"].shape[1]
    out_pad = params["b234"].shape[1] - 2 * hid   # padded to a multiple of 128

    num_tc = _tensorcores_per_chip()
    tile_b, num_tiles, b_pad = _choose_batch_tile(B, num_tc, max_tile_b)

    # Skip the pad op entirely when the batch already matches the tiling.
    if b_pad != B:
        x = jnp.pad(x, ((0, b_pad - B), (0, 0)))

    flops = 2 * b_pad * (in_features * hid + 2 * hid * hid + hid * out_pad)
    bytes_accessed = (b_pad * in_features * 4 + b_pad * out_pad * 4
                      + sum(int(v.size) * v.dtype.itemsize
                            for v in params.values()))

    const_spec = lambda a: pl.BlockSpec(a.shape, lambda i: (0, 0))  # VMEM-resident

    kernel = functools.partial(actor_mlp_kernel, hid=hid)

    out = pl.pallas_call(
        kernel,
        out_shape=jax.ShapeDtypeStruct((b_pad, out_pad), jnp.float32),
        grid=(num_tiles,),
        in_specs=[
            pl.BlockSpec((tile_b, in_features), lambda i: (i, 0)),  # stream batch
            const_spec(params["w1"]), const_spec(params["b1"]),
            const_spec(params["w234"]), const_spec(params["b234"]),
        ],
        out_specs=pl.BlockSpec((tile_b, out_pad), lambda i: (i, 0)),
        compiler_params=pltpu.CompilerParams(
            dimension_semantics=("parallel",)),   # shards tiles across TCs on v7x
        cost_estimate=pl.CostEstimate(
            flops=flops, transcendentals=0, bytes_accessed=bytes_accessed),
    )(x, params["w1"], params["b1"], params["w234"], params["b234"])

    return out[:B, :n_actions]


def init_actor_params(key, in_features, n_actions, hid_dim=128):
    """Init mimicking nn.Linear default U[-1/sqrt(fan_in), 1/sqrt(fan_in)].

    Weights stored transposed (fan_in, fan_out). Layer 1 stays f32 (tiny, keeps
    observation precision); layers 2-4 are concatenated into one bf16 block with
    the final layer zero-padded to 128 output lanes. Biases are f32.
    """
    out_pad = max(128, ((n_actions + 127) // 128) * 128)
    dims = [(in_features, hid_dim), (hid_dim, hid_dim),
            (hid_dim, hid_dim), (hid_dim, n_actions)]
    raw_w, raw_b = [], []
    for fin, fout in dims:
        key, kw, kb = jax.random.split(key, 3)
        bound = 1.0 / float(fin) ** 0.5
        raw_w.append(jax.random.uniform(kw, (fin, fout), jnp.float32,
                                        minval=-bound, maxval=bound))
        raw_b.append(jax.random.uniform(kb, (1, fout), jnp.float32,
                                        minval=-bound, maxval=bound))
    # Pad the final layer to lane-dense out_pad columns.
    raw_w[3] = jnp.pad(raw_w[3], ((0, 0), (0, out_pad - n_actions)))
    raw_b[3] = jnp.pad(raw_b[3], ((0, 0), (0, out_pad - n_actions)))

    return {
        "w1": raw_w[0],                                             # f32
        "b1": raw_b[0],                                             # f32
        "w234": jnp.concatenate(raw_w[1:], axis=1).astype(jnp.bfloat16),
        "b234": jnp.concatenate(raw_b[1:], axis=1),                 # f32
    }


def actor_reference(x, params, n_actions):
    """Pure-JAX reference replicating the kernel's precision path."""
    hid = params["w1"].shape[1]
    w234 = params["w234"].astype(jnp.float32)
    b234 = params["b234"]

    def layer(h, w, b, relu):
        h = h.astype(jnp.bfloat16).astype(jnp.float32)
        y = h @ w + b
        return jax.nn.relu(y) if relu else y

    h = jax.nn.relu(x @ params["w1"] + params["b1"])                 # full f32
    h = layer(h, w234[:, :hid], b234[:, :hid], True)
    h = layer(h, w234[:, hid:2 * hid], b234[:, hid:2 * hid], True)
    y = layer(h, w234[:, 2 * hid:], b234[:, 2 * hid:], False)
    return y[:, :n_actions]


if __name__ == "__main__":
    # LunarLander-v2: 8-dim observation, 4 discrete actions, 128-hidden MLP.
    IN_FEATURES, N_ACTIONS, HID_DIM = 8, 4, 128
    BATCH = 256  # typical aligned rollout micro-batch

    key = jax.random.PRNGKey(0)
    key, kx = jax.random.split(key)
    x = jax.random.normal(kx, (BATCH, IN_FEATURES), jnp.float32)

    params = init_actor_params(key, IN_FEATURES, N_ACTIONS, HID_DIM)

    out = actor_forward(x, params, N_ACTIONS)
    out = jax.block_until_ready(out)

    ref = actor_reference(x, params, N_ACTIONS)
    assert out.shape == (BATCH, N_ACTIONS)
    assert jnp.allclose(out, ref, atol=1e-3, rtol=1e-3), "mismatch vs reference"

    print("KERNEL_OK")
</pallas_src>

<mosaic_0001>
module attributes {stable_mosaic.version = 11 : i64} {
  func.func @actor_mlp_kernel(%arg0: i32, %arg1: memref<256x8xf32, #tpu.memory_space<vmem>>, %arg2: memref<8x128xf32, #tpu.memory_space<vmem>>, %arg3: memref<1x128xf32, #tpu.memory_space<vmem>>, %arg4: memref<128x384xbf16, #tpu.memory_space<vmem>>, %arg5: memref<1x384xf32, #tpu.memory_space<vmem>>, %arg6: memref<256x128xf32, #tpu.memory_space<vmem>>) attributes {dimension_semantics = [#tpu.dimension_semantics<parallel>], iteration_bounds = array<i64: 1>, scalar_prefetch = 0 : i64, scratch_operands = 0 : i64, tpu.core_type = #tpu.core_type<tc>, window_params = [{transform_indices = @transform_0, window_bounds = array<i64: 256, 8>}, {pipeline_mode = #tpu.pipeline_mode<synchronous>, transform_indices = @transform_1, window_bounds = array<i64: 8, 128>}, {pipeline_mode = #tpu.pipeline_mode<synchronous>, transform_indices = @transform_2, window_bounds = array<i64: 1, 128>}, {pipeline_mode = #tpu.pipeline_mode<synchronous>, transform_indices = @transform_3, window_bounds = array<i64: 128, 384>}, {pipeline_mode = #tpu.pipeline_mode<synchronous>, transform_indices = @transform_4, window_bounds = array<i64: 1, 384>}, {transform_indices = @transform_5, window_bounds = array<i64: 256, 128>}]} {
    %c0 = arith.constant 0 : index
    %c0_0 = arith.constant 0 : index
    %0 = vector.load %arg1[%c0, %c0_0] : memref<256x8xf32, #tpu.memory_space<vmem>>, vector<256x8xf32>
    %c0_1 = arith.constant 0 : index
    %c0_2 = arith.constant 0 : index
    %1 = vector.load %arg2[%c0_1, %c0_2] : memref<8x128xf32, #tpu.memory_space<vmem>>, vector<8x128xf32>
    %cst = arith.constant dense<0.000000e+00> : vector<256x128xf32>
    %2 = tpu.matmul %0, %1, %cst {dimension_numbers = #tpu.dot_dimension_numbers<[1], [0], [0], [1], [0, 0, 1, 1], [], []>} : vector<256x8xf32>, vector<8x128xf32>, vector<256x128xf32> -> vector<256x128xf32>
    %c0_3 = arith.constant 0 : index
    %c0_4 = arith.constant 0 : index
    %3 = vector.load %arg3[%c0_3, %c0_4] : memref<1x128xf32, #tpu.memory_space<vmem>>, vector<1x128xf32>
    %4 = vector.broadcast %3 : vector<1x128xf32> to vector<256x128xf32>
    %5 = arith.addf %2, %4 : vector<256x128xf32>
    %cst_5 = arith.constant 0.000000e+00 : f32
    %6 = vector.broadcast %cst_5 : f32 to vector<256x128xf32>
    %7 = arith.maximumf %5, %6 : vector<256x128xf32>
    %8 = arith.truncf %7 : vector<256x128xf32> to vector<256x128xbf16>
    %c0_6 = arith.constant 0 : index
    %c0_7 = arith.constant 0 : index
    %9 = vector.load %arg4[%c0_6, %c0_7] : memref<128x384xbf16, #tpu.memory_space<vmem>>, vector<128x128xbf16>
    %cst_8 = arith.constant dense<0.000000e+00> : vector<256x128xf32>
    %10 = tpu.matmul %8, %9, %cst_8 {dimension_numbers = #tpu.dot_dimension_numbers<[1], [0], [0], [1], [0, 0, 1, 1], [], []>} : vector<256x128xbf16>, vector<128x128xbf16>, vector<256x128xf32> -> vector<256x128xf32>
    %c0_9 = arith.constant 0 : index
    %c0_10 = arith.constant 0 : index
    %11 = vector.load %arg5[%c0_9, %c0_10] : memref<1x384xf32, #tpu.memory_space<vmem>>, vector<1x128xf32>
    %12 = vector.broadcast %11 : vector<1x128xf32> to vector<256x128xf32>
    %13 = arith.addf %10, %12 : vector<256x128xf32>
    %cst_11 = arith.constant 0.000000e+00 : f32
    %14 = vector.broadcast %cst_11 : f32 to vector<256x128xf32>
    %15 = arith.maximumf %13, %14 : vector<256x128xf32>
    %16 = arith.truncf %15 : vector<256x128xf32> to vector<256x128xbf16>
    %c0_12 = arith.constant 0 : index
    %c128 = arith.constant 128 : index
    %17 = vector.load %arg4[%c0_12, %c128] : memref<128x384xbf16, #tpu.memory_space<vmem>>, vector<128x128xbf16>
    %cst_13 = arith.constant dense<0.000000e+00> : vector<256x128xf32>
    %18 = tpu.matmul %16, %17, %cst_13 {dimension_numbers = #tpu.dot_dimension_numbers<[1], [0], [0], [1], [0, 0, 1, 1], [], []>} : vector<256x128xbf16>, vector<128x128xbf16>, vector<256x128xf32> -> vector<256x128xf32>
    %c0_14 = arith.constant 0 : index
    %c128_15 = arith.constant 128 : index
    %19 = vector.load %arg5[%c0_14, %c128_15] : memref<1x384xf32, #tpu.memory_space<vmem>>, vector<1x128xf32>
    %20 = vector.broadcast %19 : vector<1x128xf32> to vector<256x128xf32>
    %21 = arith.addf %18, %20 : vector<256x128xf32>
    %cst_16 = arith.constant 0.000000e+00 : f32
    %22 = vector.broadcast %cst_16 : f32 to vector<256x128xf32>
    %23 = arith.maximumf %21, %22 : vector<256x128xf32>
    %24 = arith.truncf %23 : vector<256x128xf32> to vector<256x128xbf16>
    %c0_17 = arith.constant 0 : index
    %c256 = arith.constant 256 : index
    %25 = vector.load %arg4[%c0_17, %c256] : memref<128x384xbf16, #tpu.memory_space<vmem>>, vector<128x128xbf16>
    %cst_18 = arith.constant dense<0.000000e+00> : vector<256x128xf32>
    %26 = tpu.matmul %24, %25, %cst_18 {dimension_numbers = #tpu.dot_dimension_numbers<[1], [0], [0], [1], [0, 0, 1, 1], [], []>} : vector<256x128xbf16>, vector<128x128xbf16>, vector<256x128xf32> -> vector<256x128xf32>
    %c0_19 = arith.constant 0 : index
    %c256_20 = arith.constant 256 : index
    %27 = vector.load %arg5[%c0_19, %c256_20] : memref<1x384xf32, #tpu.memory_space<vmem>>, vector<1x128xf32>
    %28 = vector.broadcast %27 : vector<1x128xf32> to vector<256x128xf32>
    %29 = arith.addf %26, %28 : vector<256x128xf32>
    %c0_21 = arith.constant 0 : index
    %c0_22 = arith.constant 0 : index
    %30 = vector.load %arg6[%c0_21, %c0_22] : memref<256x128xf32, #tpu.memory_space<vmem>>, vector<256x128xf32>
    tpu.vector_store %arg6[%c0_21, %c0_22], %29 {strides = array<i32>} : memref<256x128xf32, #tpu.memory_space<vmem>>, vector<256x128xf32>,
    return
  }
  func.func @transform_0(%arg0: i32) -> (i32, i32) {
    %c0_i32 = arith.constant 0 : i32
    %c0_i32_0 = arith.constant 0 : i32
    return %arg0, %c0_i32 : i32, i32
  }
  func.func @transform_1(%arg0: i32) -> (i32, i32) {
    %c0_i32 = arith.constant 0 : i32
    %c0_i32_0 = arith.constant 0 : i32
    %c0_i32_1 = arith.constant 0 : i32
    return %c0_i32, %c0_i32_0 : i32, i32
  }
  func.func @transform_2(%arg0: i32) -> (i32, i32) {
    %c0_i32 = arith.constant 0 : i32
    %c0_i32_0 = arith.constant 0 : i32
    %c0_i32_1 = arith.constant 0 : i32
    return %c0_i32, %c0_i32_0 : i32, i32
  }
  func.func @transform_3(%arg0: i32) -> (i32, i32) {
    %c0_i32 = arith.constant 0 : i32
    %c0_i32_0 = arith.constant 0 : i32
    %c0_i32_1 = arith.constant 0 : i32
    return %c0_i32, %c0_i32_0 : i32, i32
  }
  func.func @transform_4(%arg0: i32) -> (i32, i32) {
    %c0_i32 = arith.constant 0 : i32
    %c0_i32_0 = arith.constant 0 : i32
    %c0_i32_1 = arith.constant 0 : i32
    return %c0_i32, %c0_i32_0 : i32, i32
  }
  func.func @transform_5(%arg0: i32) -> (i32, i32) {
    %c0_i32 = arith.constant 0 : i32
    %c0_i32_0 = arith.constant 0 : i32
    return %arg0, %c0_i32 : i32, i32
  }
}

</mosaic_0001>

<bundles_post_ra>
// kernel: actor_forward.1
= control target key start
LH: loop header
LB: loop body
LE: loop exit
PB: predicated region body
PF: predicated region fallthrough
CT: control target
= control target key end

     0   :  { %vm61_vm0 = vcmask 64512   ;;  %s2153_s1 = inlined_call_operand.vmem [shape: f32[8,128], index: 1, kind: input, shape index: {}]   ;;  %s2154_s0 = inlined_call_operand.vmem [shape: f32[256,8], index: 0, kind: input, shape index: {}]   ;;  %s2155_s3 = inlined_call_operand.vmem [shape: bf16[128,384], index: 3, kind: input, shape index: {}]   ;;  %s2156_s2 = inlined_call_operand.vmem [shape: f32[1,128], index: 2, kind: input, shape index: {}]   ;;  %s2157_s4 = inlined_call_operand.vmem [shape: f32[1,384], index: 4, kind: input, shape index: {}]   ;;  %s2158_s5 = inlined_call_operand.vmem [shape: f32[256,128], index: 5, kind: output, shape index: {}]  }
   0x1   :  { %v53_v0 = vld [vmem:[%s2153_s1] sm:$0xff]  ;;  %v22_v2 = vld [vmem:[%s2154_s0 + $0x8] sm:$0xff]  ;;  %v23_v3 = vld [vmem:[%s2154_s0 + $0x10] sm:$0xff] }
   0x2   :  { %v21_v1 = vld [vmem:[%s2154_s0] sm:$0xff]  ;;  %1424 = vmatprep.subr.mxu0 %v53_v0  ;;  %v24_v4 = vld [vmem:[%s2154_s0 + $0x18] sm:$0xff]  ;;  %v26_v6 = vld [vmem:[%s2154_s0 + $0x28] sm:$0xff] }
   0x3   :  { %1426 = vmatprep.mubr.msk.f32.mxu0 %vm61_vm0, %v21_v1  ;;  %1425 = vmatpush3.msra.mxu0 %v53_v0  ;;  %v25_v5 = vld [vmem:[%s2154_s0 + $0x20] sm:$0xff]  ;;  %v27_v7 = vld [vmem:[%s2154_s0 + $0x30] sm:$0xff]  ;;  %v28_v8 = vld [vmem:[%s2154_s0 + $0x38] sm:$0xff] }
   0x4   :  { %1427 = vmatmul.mubr.msk.f32.vlgmr.msra.gmra.mxu0 %vm61_vm0, %v22_v2  ;;  %v1634_v9 = vld [vmem:[%s2155_s3 + $0xa8] ss:$12 sps:$4 sm:$0xff]   ;;  %v1635_v10 = vld [vmem:[%s2155_s3 + $0x90] ss:$12 sps:$4 sm:$0xff]   ;;  %v29_v11 = vld [vmem:[%s2154_s0 + $0x40] sm:$0xff] }
   0x5   :  { %1429 = vmatprep.mubr.msk.f32.mxu0 %vm61_vm0, %v23_v3  ;;  %1474 = vmatprep.subr.bf16.mxu1 %v1634_v9  ;;  %v30_v12 = vld [vmem:[%s2154_s0 + $0x48] sm:$0xff]  ;;  %v31_v13 = vld [vmem:[%s2154_s0 + $0x50] sm:$0xff]  ;;  %v1636_v14 = vld [vmem:[%s2155_s3 + $0x78] ss:$12 sps:$4 sm:$0xff]  }
   0x6   :  { %1475 = vmatpush3.bf16.msra.mxu1 %v1634_v9  ;;  %v1637_v15 = vld [vmem:[%s2155_s3 + $0x60] ss:$12 sps:$4 sm:$0xff]   ;;  %v32_v16 = vld [vmem:[%s2154_s0 + $0x58] sm:$0xff]  ;;  %v1638_v18 = vld [vmem:[%s2155_s3 + $0x48] ss:$12 sps:$4 sm:$0xff]  }
   0x7   :  { %1476 = vmatprep.subr.bf16.mxu1 %v1635_v10  ;;  %v33_v17 = vld [vmem:[%s2154_s0 + $0x60] sm:$0xff]  ;;  %v34_v19 = vld [vmem:[%s2154_s0 + $0x68] sm:$0xff]  ;;  %v35_v20 = vld [vmem:[%s2154_s0 + $0x70] sm:$0xff] }
   0x8   :  { %1430 = vmatmul.mubr.msk.f32.gmra.mxu0 %vm61_vm0, %v24_v4  ;;  %v36_v21 = vld [vmem:[%s2154_s0 + $0x78] sm:$0xff]  ;;  %v37_v22 = vld [vmem:[%s2154_s0 + $0x80] sm:$0xff]  ;;  %v38_v23 = vld [vmem:[%s2154_s0 + $0x88] sm:$0xff] }
   0x9   :  { %1432 = vmatprep.mubr.msk.f32.mxu0 %vm61_vm0, %v25_v5  ;;  %v39_v24 = vld [vmem:[%s2154_s0 + $0x90] sm:$0xff]  ;;  %v40_v25 = vld [vmem:[%s2154_s0 + $0x98] sm:$0xff]  ;;  %v41_v26 = vld [vmem:[%s2154_s0 + $0xa0] sm:$0xff] }
   0xa   :  { %1477 = vmatpush3.bf16.msra.mxu1 %v1635_v10  ;;  %v42_v27 = vld [vmem:[%s2154_s0 + $0xa8] sm:$0xff]  ;;  %v43_v28 = vld [vmem:[%s2154_s0 + $0xb0] sm:$0xff]  ;;  %v44_v29 = vld [vmem:[%s2154_s0 + $0xb8] sm:$0xff] }
   0xb   :  { %1478 = vmatprep.subr.bf16.mxu1 %v1636_v14  ;;  %v45_v30 = vld [vmem:[%s2154_s0 + $0xc0] sm:$0xff]  ;;  %v46_v31 = vld [vmem:[%s2154_s0 + $0xc8] sm:$0xff]  ;;  %v47_v32 = vld [vmem:[%s2154_s0 + $0xd0] sm:$0xff] }
   0xc   :  { %1433 = vmatmul.mubr.msk.f32.gmra.mxu0 %vm61_vm0, %v26_v6  ;;  %v48_v33 = vld [vmem:[%s2154_s0 + $0xd8] sm:$0xff]  ;;  %v49_v34 = vld [vmem:[%s2154_s0 + $0xe0] sm:$0xff]  ;;  %v50_v35 = vld [vmem:[%s2154_s0 + $0xe8] sm:$0xff] }
   0xd   :  { %1435 = vmatprep.mubr.msk.f32.mxu0 %vm61_vm0, %v27_v7  ;;  %v51_v36 = vld [vmem:[%s2154_s0 + $0xf0] sm:$0xff]  ;;  %v52_v37 = vld [vmem:[%s2154_s0 + $0xf8] sm:$0xff]  ;;  %v1641_v40 = vld [vmem:[%s2155_s3] ss:$12 sps:$4 sm:$0xff]  }
   0xe   :  { %1479 = vmatpush3.bf16.msra.mxu1 %v1636_v14  ;;  %v1639_v38 = vld [vmem:[%s2155_s3 + $0x30] ss:$12 sps:$4 sm:$0xff]   ;;  %v1640_v39 = vld [vmem:[%s2155_s3 + $0x18] ss:$12 sps:$4 sm:$0xff]   ;;  %v1643_v42 = vld [vmem:[%s2155_s3 + $0x94] ss:$12 sps:$4 sm:$0xff]  }
   0xf   :  { %1480 = vmatprep.subr.bf16.mxu1 %v1637_v15  ;;  %v1642_v41 = vld [vmem:[%s2155_s3 + $0xac] ss:$12 sps:$4 sm:$0xff]   ;;  %v1644_v43 = vld [vmem:[%s2155_s3 + $0x7c] ss:$12 sps:$4 sm:$0xff]   ;;  %v1645_v44 = vld [vmem:[%s2155_s3 + $0x64] ss:$12 sps:$4 sm:$0xff]  }
  0x10   :  { %1436 = vmatmul.mubr.msk.f32.gmra.mxu0 %vm61_vm0, %v28_v8  ;;  %1522 = vmatprep.subr.bf16.mxu0 %v1642_v41  ;;  %v1646_v45 = vld [vmem:[%s2155_s3 + $0x4c] ss:$12 sps:$4 sm:$0xff]   ;;  %v1647_v46 = vld [vmem:[%s2155_s3 + $0x34] ss:$12 sps:$4 sm:$0xff]   ;;  %v1648_v47 = vld [vmem:[%s2155_s3 + $0x1c] ss:$12 sps:$4 sm:$0xff]  }
  0x11   :  { %1438 = vmatprep.mubr.msk.f32.mxu0 %vm61_vm0, %v29_v11  ;;  %1523 = vmatpush3.bf16.msra.mxu0 %v1642_v41  ;;  %v1867_v48 = vld [vmem:[%s2156_s2] ss:$0 sm:$0xff] }
  0x12   :  { %1481 = vmatpush3.bf16.msra.mxu1 %v1637_v15  ;;  %1524 = vmatprep.subr.bf16.mxu0 %v1643_v42 }
  0x13   :  { %1482 = vmatprep.subr.bf16.mxu1 %v1638_v18 }
  0x14   :  { %1439 = vmatmul.mubr.msk.f32.gmra.mxu0 %vm61_vm0, %v30_v12 }
  0x15   :  { %1441 = vmatprep.mubr.msk.f32.mxu0 %vm61_vm0, %v31_v13  ;;  %1525 = vmatpush3.bf16.msra.mxu0 %v1643_v42 }
  0x16   :  { %1483 = vmatpush3.bf16.msra.mxu1 %v1638_v18  ;;  %1526 = vmatprep.subr.bf16.mxu0 %v1644_v43 }
  0x17   :  { %1484 = vmatprep.subr.bf16.mxu1 %v1639_v38 }
  0x18   :  { %1442 = vmatmul.mubr.msk.f32.gmra.mxu0 %vm61_vm0, %v32_v16 }
  0x19   :  { %1444 = vmatprep.mubr.msk.f32.mxu0 %vm61_vm0, %v33_v17  ;;  %1527 = vmatpush3.bf16.msra.mxu0 %v1644_v43 }
  0x1a   :  { %1485 = vmatpush3.bf16.msra.mxu1 %v1639_v38  ;;  %1528 = vmatprep.subr.bf16.mxu0 %v1645_v44 }
  0x1b   :  { %1486 = vmatprep.subr.bf16.mxu1 %v1640_v39 }
  0x1c   :  { %1445 = vmatmul.mubr.msk.f32.gmra.mxu0 %vm61_vm0, %v34_v19 }
  0x1d   :  { %1447 = vmatprep.mubr.msk.f32.mxu0 %vm61_vm0, %v35_v20  ;;  %1529 = vmatpush3.bf16.msra.mxu0 %v1645_v44 }
  0x1e   :  { %1487 = vmatpush3.bf16.msra.mxu1 %v1640_v39  ;;  %1530 = vmatprep.subr.bf16.mxu0 %v1646_v45 }
  0x1f   :  { %1488 = vmatprep.subr.bf16.mxu1 %v1641_v40 }
  0x20   :  { %1448 = vmatmul.mubr.msk.f32.gmra.mxu0 %vm61_vm0, %v36_v21 }
  0x21   :  { %1450 = vmatprep.mubr.msk.f32.mxu0 %vm61_vm0, %v37_v22  ;;  %1531 = vmatpush3.bf16.msra.mxu0 %v1646_v45 }
  0x22   :  { %1489 = vmatpush3.bf16.msra.mxu1 %v1641_v40  ;;  %1532 = vmatprep.subr.bf16.mxu0 %v1647_v46 }
  0x24   :  { %1451 = vmatmul.mubr.msk.f32.gmra.mxu0 %vm61_vm0, %v38_v23 }
  0x25   :  { %1453 = vmatprep.mubr.msk.f32.mxu0 %vm61_vm0, %v39_v24  ;;  %1533 = vmatpush3.bf16.msra.mxu0 %v1647_v46 }
  0x26   :  { %1534 = vmatprep.subr.bf16.mxu0 %v1648_v47 }
  0x28   :  { %1454 = vmatmul.mubr.msk.f32.gmra.mxu0 %vm61_vm0, %v40_v25 }
  0x29   :  { %1456 = vmatprep.mubr.msk.f32.mxu0 %vm61_vm0, %v41_v26  ;;  %1535 = vmatpush3.bf16.msra.mxu0 %v1648_v47 }
  0x2c   :  { %1457 = vmatmul.mubr.msk.f32.gmra.mxu0 %vm61_vm0, %v42_v27 }
  0x2d   :  { %1459 = vmatprep.mubr.msk.f32.mxu0 %vm61_vm0, %v43_v28 }
  0x30   :  { %1460 = vmatmul.mubr.msk.f32.gmra.mxu0 %vm61_vm0, %v44_v29 }
  0x31   :  { %1462 = vmatprep.mubr.msk.f32.mxu0 %vm61_vm0, %v45_v30 }
  0x34   :  { %1463 = vmatmul.mubr.msk.f32.gmra.mxu0 %vm61_vm0, %v46_v31 }
  0x35   :  { %1465 = vmatprep.mubr.msk.f32.mxu0 %vm61_vm0, %v47_v32 }
  0x38   :  { %1466 = vmatmul.mubr.msk.f32.gmra.mxu0 %vm61_vm0, %v48_v33 }
  0x39   :  { %1468 = vmatprep.mubr.msk.f32.mxu0 %vm61_vm0, %v49_v34 }
  0x3c   :  { %1469 = vmatmul.mubr.msk.f32.gmra.mxu0 %vm61_vm0, %v50_v35 }
  0x3d   :  { %1471 = vmatprep.mubr.msk.f32.mxu0 %vm61_vm0, %v51_v36 }
  0x40   :  { %1472 = vmatmul.mubr.msk.f32.gmra.mxu0 %vm61_vm0, %v52_v37 }
  0xc4   :  { %v1428_v49 = vpop.f32.mrf.mxu0 }
  0xc5   :  { %v230_v50 = vadd.f32 %v1428_v49, %v1867_v48 }
  0xc6   :  { %v224_v51 = vpop.f32.mrf.mxu0 }
  0xc7   :  { %v225_v52 = vadd.f32 %v1867_v48, %v224_v51  ;;  %v384_v54 = vmax.f32 %v230_v50, 0.0 }
  0xc8   :  { %v1431_v53 = vpop.f32.mrf.mxu0 }
  0xc9   :  { %v383_v55 = vmax.f32 %v225_v52, 0.0  ;;  %v240_v56 = vadd.f32 %v1431_v53, %v1867_v48 }
  0xca   :  { %v234_v57 = vpop.f32.mrf.mxu0 }
  0xcb   :  { %v235_v58 = vadd.f32 %v1867_v48, %v234_v57  ;;  %v415_v59 = vpack.c.bf16 %v384_v54, %v383_v55  ;;  %v386_v61 = vmax.f32 %v240_v56, 0.0 }
  0xcc   :  { %v1434_v60 = vpop.f32.mrf.mxu0 }
  0xcd   :  { %v385_v62 = vmax.f32 %v235_v58, 0.0  ;;  %v250_v63 = vadd.f32 %v1434_v60, %v1867_v48  ;;  %1490 = vmatprep.mubr.bf16.mxu1 %v415_v59 }
  0xce   :  { %v244_v0 = vpop.f32.mrf.mxu0 }
  0xcf   :  { %v416_v1 = vpack.c.bf16 %v386_v61, %v385_v62  ;;  %v245_v2 = vadd.f32 %v1867_v48, %v244_v0  ;;  %v388_v4 = vmax.f32 %v250_v63, 0.0 }
  0xd0   :  { %v1437_v3 = vpop.f32.mrf.mxu0 }
  0xd1   :  { %v387_v5 = vmax.f32 %v245_v2, 0.0  ;;  %v260_v6 = vadd.f32 %v1437_v3, %v1867_v48  ;;  %1491 = vmatmul.mubr.bf16.vlgmr.msra.gmra.mxu1 %v416_v1 }
  0xd2   :  { %v254_v7 = vpop.f32.mrf.mxu0 }
  0xd3   :  { %v417_v8 = vpack.c.bf16 %v388_v4, %v387_v5  ;;  %v255_v9 = vadd.f32 %v1867_v48, %v254_v7  ;;  %v390_v11 = vmax.f32 %v260_v6, 0.0 }
  0xd4   :  { %v1440_v10 = vpop.f32.mrf.mxu0 }
  0xd5   :  { %v389_v12 = vmax.f32 %v255_v9, 0.0  ;;  %v270_v13 = vadd.f32 %v1440_v10, %v1867_v48  ;;  %1494 = vmatprep.mubr.bf16.mxu1 %v417_v8 }
  0xd6   :  { %v264_v14 = vpop.f32.mrf.mxu0 }
  0xd7   :  { %v418_v15 = vpack.c.bf16 %v390_v11, %v389_v12  ;;  %v265_v16 = vadd.f32 %v1867_v48, %v264_v14  ;;  %v392_v18 = vmax.f32 %v270_v13, 0.0 }
  0xd8   :  { %v1443_v17 = vpop.f32.mrf.mxu0 }
  0xd9   :  { %v391_v19 = vmax.f32 %v265_v16, 0.0  ;;  %v280_v20 = vadd.f32 %v1443_v17, %v1867_v48  ;;  %1495 = vmatmul.mubr.bf16.gmra.mxu1 %v418_v15 }
  0xda   :  { %v274_v21 = vpop.f32.mrf.mxu0 }
  0xdb   :  { %v419_v22 = vpack.c.bf16 %v392_v18, %v391_v19  ;;  %v275_v23 = vadd.f32 %v1867_v48, %v274_v21  ;;  %v394_v25 = vmax.f32 %v280_v20, 0.0 }
  0xdc   :  { %v1446_v24 = vpop.f32.mrf.mxu0 }
  0xdd   :  { %v393_v26 = vmax.f32 %v275_v23, 0.0  ;;  %v290_v27 = vadd.f32 %v1446_v24, %v1867_v48  ;;  %1498 = vmatprep.mubr.bf16.mxu1 %v419_v22 }
  0xde   :  { %v284_v28 = vpop.f32.mrf.mxu0 }
  0xdf   :  { %v420_v29 = vpack.c.bf16 %v394_v25, %v393_v26  ;;  %v285_v30 = vadd.f32 %v1867_v48, %v284_v28  ;;  %v396_v32 = vmax.f32 %v290_v27, 0.0 }
  0xe0   :  { %v1449_v31 = vpop.f32.mrf.mxu0 }
  0xe1   :  { %v395_v33 = vmax.f32 %v285_v30, 0.0  ;;  %v300_v34 = vadd.f32 %v1449_v31, %v1867_v48  ;;  %1499 = vmatmul.mubr.bf16.gmra.mxu1 %v420_v29 }
  0xe2   :  { %v294_v35 = vpop.f32.mrf.mxu0 }
  0xe3   :  { %v421_v36 = vpack.c.bf16 %v396_v32, %v395_v33  ;;  %v295_v37 = vadd.f32 %v1867_v48, %v294_v35  ;;  %v398_v39 = vmax.f32 %v300_v34, 0.0  ;;  %v1649_v34 = vld [vmem:[%s2155_s3 + $0x4] ss:$12 sps:$4 sm:$0xff]  }
  0xe4   :  { %v1452_v38 = vpop.f32.mrf.mxu0  ;;  %1536 = vmatprep.subr.bf16.mxu0 %v1649_v34  ;;  %v1650_v35 = vld [vmem:[%s2155_s3 + $0xb0] ss:$12 sps:$4 sm:$0xff]  }
  0xe5   :  { %v397_v40 = vmax.f32 %v295_v37, 0.0  ;;  %v310_v41 = vadd.f32 %v1452_v38, %v1867_v48  ;;  %1502 = vmatprep.mubr.bf16.mxu1 %v421_v36  ;;  %1537 = vmatpush3.bf16.msra.mxu0 %v1649_v34  ;;  %v1652_v36 = vld [vmem:[%s2155_s3 + $0x80] ss:$12 sps:$4 sm:$0xff]   ;;  %v1916_v37 = vld [vmem:[%s2155_s3 + $0x68] ss:$12 sps:$4 sm:$0xff]  }
  0xe6   :  { %v304_v42 = vpop.f32.mrf.mxu0  ;;  %1618 = vmatprep.subr.bf16.mxu1 %v1650_v35  ;;  %1570 = vmatprep.subr.bf16.mxu0 %v1650_v35  ;;  %v1922_v38 = vld [vmem:[%s2155_s3 + $0x50] ss:$12 sps:$4 sm:$0xff]  }
  0xe7   :  { %v422_v43 = vpack.c.bf16 %v398_v39, %v397_v40  ;;  %v305_v44 = vadd.f32 %v1867_v48, %v304_v42  ;;  %v400_v46 = vmax.f32 %v310_v41, 0.0  ;;  %1626 = vmatpush3.bf16.msra.mxu1 %v1650_v35  ;;  %v1929_v39 = vld [vmem:[%s2155_s3 + $0x38] ss:$12 sps:$4 sm:$0xff]   ;;  %v1937_v42 = vld [vmem:[%s2157_s4] ss:$0 sm:$0xff] }
  0xe8   :  { %v1455_v45 = vpop.f32.mrf.mxu0 }
  0xe9   :  { %v399_v47 = vmax.f32 %v305_v44, 0.0  ;;  %v320_v49 = vadd.f32 %v1455_v45, %v1867_v48  ;;  %1503 = vmatmul.mubr.bf16.gmra.mxu1 %v422_v43 }
  0xea   :  { %v314_v50 = vpop.f32.mrf.mxu0 }
  0xeb   :  { %v423_v51 = vpack.c.bf16 %v400_v46, %v399_v47  ;;  %v315_v52 = vadd.f32 %v1867_v48, %v314_v50  ;;  %v402_v54 = vmax.f32 %v320_v49, 0.0 }
  0xec   :  { %v1458_v53 = vpop.f32.mrf.mxu0 }
  0xed   :  { %v401_v55 = vmax.f32 %v315_v52, 0.0  ;;  %v330_v56 = vadd.f32 %v1458_v53, %v1867_v48  ;;  %1506 = vmatprep.mubr.bf16.mxu1 %v423_v51 }
  0xee   :  { %v324_v57 = vpop.f32.mrf.mxu0 }
  0xef   :  { %v424_v58 = vpack.c.bf16 %v402_v54, %v401_v55  ;;  %v325_v59 = vadd.f32 %v1867_v48, %v324_v57  ;;  %v404_v61 = vmax.f32 %v330_v56, 0.0 }
  0xf0   :  { %v1461_v60 = vpop.f32.mrf.mxu0 }
  0xf1   :  { %v403_v62 = vmax.f32 %v325_v59, 0.0  ;;  %v340_v63 = vadd.f32 %v1461_v60, %v1867_v48  ;;  %1507 = vmatmul.mubr.bf16.gmra.mxu1 %v424_v58 }
  0xf2   :  { %v334_v0 = vpop.f32.mrf.mxu0 }
  0xf3   :  { %v425_v1 = vpack.c.bf16 %v404_v61, %v403_v62  ;;  %v335_v2 = vadd.f32 %v1867_v48, %v334_v0  ;;  %v406_v4 = vmax.f32 %v340_v63, 0.0 }
  0xf4   :  { %v1464_v3 = vpop.f32.mrf.mxu0 }
  0xf5   :  { %v405_v5 = vmax.f32 %v335_v2, 0.0  ;;  %v350_v6 = vadd.f32 %v1464_v3, %v1867_v48  ;;  %1510 = vmatprep.mubr.bf16.mxu1 %v425_v1 }
  0xf6   :  { %v344_v7 = vpop.f32.mrf.mxu0 }
  0xf7   :  { %v426_v8 = vpack.c.bf16 %v406_v4, %v405_v5  ;;  %v345_v9 = vadd.f32 %v1867_v48, %v344_v7  ;;  %v408_v11 = vmax.f32 %v350_v6, 0.0 }
  0xf8   :  { %v1467_v10 = vpop.f32.mrf.mxu0 }
  0xf9   :  { %v407_v12 = vmax.f32 %v345_v9, 0.0  ;;  %v360_v13 = vadd.f32 %v1467_v10, %v1867_v48  ;;  %1511 = vmatmul.mubr.bf16.gmra.mxu1 %v426_v8 }
  0xfa   :  { %v354_v14 = vpop.f32.mrf.mxu0 }
  0xfb   :  { %v427_v15 = vpack.c.bf16 %v408_v11, %v407_v12  ;;  %v355_v16 = vadd.f32 %v1867_v48, %v354_v14  ;;  %v410_v18 = vmax.f32 %v360_v13, 0.0 }
  0xfc   :  { %v1470_v17 = vpop.f32.mrf.mxu0 }
  0xfd   :  { %v409_v19 = vmax.f32 %v355_v16, 0.0  ;;  %v370_v20 = vadd.f32 %v1470_v17, %v1867_v48  ;;  %1514 = vmatprep.mubr.bf16.mxu1 %v427_v15 }
  0xfe   :  { %v364_v21 = vpop.f32.mrf.mxu0 }
  0xff   :  { %v428_v22 = vpack.c.bf16 %v410_v18, %v409_v19  ;;  %v365_v23 = vadd.f32 %v1867_v48, %v364_v21  ;;  %v412_v25 = vmax.f32 %v370_v20, 0.0 }
 0x100   :  { %v1473_v24 = vpop.f32.mrf.mxu0 }
 0x101   :  { %v411_v26 = vmax.f32 %v365_v23, 0.0  ;;  %v380_v27 = vadd.f32 %v1473_v24, %v1867_v48  ;;  %1515 = vmatmul.mubr.bf16.gmra.mxu1 %v428_v22 }
 0x102   :  { %v374_v28 = vpop.f32.mrf.mxu0 }
 0x103   :  { %v429_v29 = vpack.c.bf16 %v412_v25, %v411_v26  ;;  %v375_v30 = vadd.f32 %v1867_v48, %v374_v28  ;;  %v414_v31 = vmax.f32 %v380_v27, 0.0  ;;  %v1651_v48 = vld [vmem:[%s2155_s3 + $0x98] ss:$12 sps:$4 sm:$0xff]  }
 0x104   :  { %1619 = vmatprep.subr.bf16.mxu1 %v1651_v48 }
 0x105   :  { %v413_v32 = vmax.f32 %v375_v30, 0.0  ;;  %1518 = vmatprep.mubr.bf16.mxu1 %v429_v29  ;;  %1627 = vmatpush3.bf16.msra.mxu1 %v1651_v48 }
 0x106   :  { %1620 = vmatprep.subr.bf16.mxu1 %v1652_v36 }
 0x107   :  { %v430_v33 = vpack.c.bf16 %v414_v31, %v413_v32 }
 0x109   :  { %1519 = vmatmul.mubr.bf16.gmra.mxu1 %v430_v33 }
 0x10a   :  { %1628 = vmatpush3.bf16.msra.mxu1 %v1652_v36 }
 0x10b   :  { %1621 = vmatprep.subr.bf16.mxu1 %v1916_v37 }
 0x10e   :  { %1629 = vmatpush3.bf16.msra.mxu1 %v1916_v37 }
 0x10f   :  { %1622 = vmatprep.subr.bf16.mxu1 %v1922_v38 }
 0x112   :  { %1630 = vmatpush3.bf16.msra.mxu1 %v1922_v38 }
 0x113   :  { %1623 = vmatprep.subr.bf16.mxu1 %v1929_v39 }
 0x116   :  { %1631 = vmatpush3.bf16.msra.mxu1 %v1929_v39 }
 0x191   :  { %v1492_v40 = vpop.f32.mrf.mxu1 }
 0x192   :  { %v545_v46 = vadd.f32 %v1492_v40, %v1937_v42 }
 0x193   :  { %v536_v41 = vpop.f32.mrf.mxu1 }
 0x194   :  { %v537_v44 = vadd.f32 %v1937_v42, %v536_v41  ;;  %v665_v54 = vmax.f32 %v545_v46, 0.0 }
 0x195   :  { %v1493_v43 = vpop.f32.mrf.mxu1 }
 0x196   :  { %v548_v45 = vadd.f32 %v1493_v43, %v1937_v42  ;;  %v663_v52 = vmax.f32 %v537_v44, 0.0 }
 0x197   :  { %v539_v47 = vpop.f32.mrf.mxu1 }
 0x198   :  { %v540_v49 = vadd.f32 %v1937_v42, %v539_v47  ;;  %v666_v50 = vmax.f32 %v548_v45, 0.0 }
 0x199   :  { %v1496_v51 = vpop.f32.mrf.mxu1 }
 0x19a   :  { %v664_v53 = vmax.f32 %v540_v49, 0.0  ;;  %v696_v57 = vpack.c.bf16 %v666_v50, %v665_v54  ;;  %v561_v61 = vadd.f32 %v1496_v51, %v1937_v42 }
 0x19b   :  { %v552_v55 = vpop.f32.mrf.mxu1 }
 0x19c   :  { %v695_v56 = vpack.c.bf16 %v664_v53, %v663_v52  ;;  %v553_v59 = vadd.f32 %v1937_v42, %v552_v55  ;;  %v669_v4 = vmax.f32 %v561_v61, 0.0 }
 0x19d   :  { %v1497_v58 = vpop.f32.mrf.mxu1 }
 0x19e   :  { %v564_v60 = vadd.f32 %v1497_v58, %v1937_v42  ;;  %1538 = vmatprep.mubr.bf16.mxu0 %v695_v56  ;;  %v667_v2 = vmax.f32 %v553_v59, 0.0 }
 0x19f   :  { %v555_v62 = vpop.f32.mrf.mxu1  ;;  %1539 = vmatmul.mubr.bf16.vlgmr.msra.gmra.mxu0 %v696_v57 }
 0x1a0   :  { %v556_v63 = vadd.f32 %v1937_v42, %v555_v62  ;;  %1571 = vmatpush3.bf16.msra.mxu0 %v1650_v35  ;;  %v670_v0 = vmax.f32 %v564_v60, 0.0 }
 0x1a1   :  { %v1500_v1 = vpop.f32.mrf.mxu1  ;;  %1572 = vmatprep.subr.bf16.mxu0 %v1651_v48 }
 0x1a2   :  { %v668_v3 = vmax.f32 %v556_v63, 0.0  ;;  %v698_v7 = vpack.c.bf16 %v670_v0, %v669_v4  ;;  %v577_v11 = vadd.f32 %v1500_v1, %v1937_v42 }
 0x1a3   :  { %v568_v5 = vpop.f32.mrf.mxu1 }
 0x1a4   :  { %v697_v6 = vpack.c.bf16 %v668_v3, %v667_v2  ;;  %1573 = vmatpush3.bf16.msra.mxu0 %v1651_v48  ;;  %v569_v9 = vadd.f32 %v1937_v42, %v568_v5  ;;  %v673_v18 = vmax.f32 %v577_v11, 0.0 }
 0x1a5   :  { %v1501_v8 = vpop.f32.mrf.mxu1  ;;  %1574 = vmatprep.subr.bf16.mxu0 %v1652_v36 }
 0x1a6   :  { %v580_v10 = vadd.f32 %v1501_v8, %v1937_v42  ;;  %1542 = vmatprep.mubr.bf16.mxu0 %v697_v6  ;;  %v671_v16 = vmax.f32 %v569_v9, 0.0 }
 0x1a7   :  { %v571_v12 = vpop.f32.mrf.mxu1  ;;  %1543 = vmatmul.mubr.bf16.gmra.mxu0 %v698_v7 }
 0x1a8   :  { %v572_v13 = vadd.f32 %v1937_v42, %v571_v12  ;;  %1575 = vmatpush3.bf16.msra.mxu0 %v1652_v36  ;;  %v674_v14 = vmax.f32 %v580_v10, 0.0 }
 0x1a9   :  { %v1504_v15 = vpop.f32.mrf.mxu1  ;;  %1576 = vmatprep.subr.bf16.mxu0 %v1916_v37 }
 0x1aa   :  { %v672_v17 = vmax.f32 %v572_v13, 0.0  ;;  %v700_v21 = vpack.c.bf16 %v674_v14, %v673_v18  ;;  %v593_v25 = vadd.f32 %v1504_v15, %v1937_v42 }
 0x1ab   :  { %v584_v19 = vpop.f32.mrf.mxu1 }
 0x1ac   :  { %v699_v20 = vpack.c.bf16 %v672_v17, %v671_v16  ;;  %1577 = vmatpush3.bf16.msra.mxu0 %v1916_v37  ;;  %v585_v23 = vadd.f32 %v1937_v42, %v584_v19  ;;  %v677_v32 = vmax.f32 %v593_v25, 0.0 }
 0x1ad   :  { %v1505_v22 = vpop.f32.mrf.mxu1  ;;  %1578 = vmatprep.subr.bf16.mxu0 %v1922_v38 }
 0x1ae   :  { %v596_v24 = vadd.f32 %v1505_v22, %v1937_v42  ;;  %1546 = vmatprep.mubr.bf16.mxu0 %v699_v20  ;;  %v675_v30 = vmax.f32 %v585_v23, 0.0 }
 0x1af   :  { %v587_v26 = vpop.f32.mrf.mxu1  ;;  %1547 = vmatmul.mubr.bf16.gmra.mxu0 %v700_v21 }
 0x1b0   :  { %v588_v27 = vadd.f32 %v1937_v42, %v587_v26  ;;  %1579 = vmatpush3.bf16.msra.mxu0 %v1922_v38  ;;  %v678_v28 = vmax.f32 %v596_v24, 0.0 }
 0x1b1   :  { %v1508_v29 = vpop.f32.mrf.mxu1  ;;  %1580 = vmatprep.subr.bf16.mxu0 %v1929_v39 }
 0x1b2   :  { %v676_v31 = vmax.f32 %v588_v27, 0.0  ;;  %v702_v35 = vpack.c.bf16 %v678_v28, %v677_v32  ;;  %v609_v38 = vadd.f32 %v1508_v29, %v1937_v42  ;;  %v1656_v27 = vld [vmem:[%s2155_s3 + $0x20] ss:$12 sps:$4 sm:$0xff]  }
 0x1b3   :  { %v600_v33 = vpop.f32.mrf.mxu1  ;;  %1624 = vmatprep.subr.bf16.mxu1 %v1656_v27 }
 0x1b4   :  { %v701_v34 = vpack.c.bf16 %v676_v31, %v675_v30  ;;  %1581 = vmatpush3.bf16.msra.mxu0 %v1929_v39  ;;  %v601_v36 = vadd.f32 %v1937_v42, %v600_v33  ;;  %v681_v47 = vmax.f32 %v609_v38, 0.0  ;;  %1632 = vmatpush3.bf16.msra.mxu1 %v1656_v27  ;;  %v1986_v30 = vld [vmem:[%s2157_s4 + $0x1] ss:$0 sm:$0xff] }
 0x1b5   :  { %v1509_v48 = vpop.f32.mrf.mxu1  ;;  %1582 = vmatprep.subr.bf16.mxu0 %v1656_v27 }
 0x1b6   :  { %v612_v37 = vadd.f32 %v1509_v48, %v1937_v42  ;;  %1550 = vmatprep.mubr.bf16.mxu0 %v701_v34  ;;  %v679_v45 = vmax.f32 %v601_v36, 0.0 }
 0x1b7   :  { %v603_v40 = vpop.f32.mrf.mxu1  ;;  %1551 = vmatmul.mubr.bf16.gmra.mxu0 %v702_v35 }
 0x1b8   :  { %v604_v41 = vadd.f32 %v1937_v42, %v603_v40  ;;  %v682_v43 = vmax.f32 %v612_v37, 0.0  ;;  %1583 = vmatpush3.bf16.msra.mxu0 %v1656_v27 }
 0x1b9   :  { %v1512_v44 = vpop.f32.mrf.mxu1 }
 0x1ba   :  { %v680_v46 = vmax.f32 %v604_v41, 0.0  ;;  %v704_v50 = vpack.c.bf16 %v682_v43, %v681_v47  ;;  %v625_v54 = vadd.f32 %v1512_v44, %v1937_v42 }
 0x1bb   :  { %v616_v49 = vpop.f32.mrf.mxu1 }
 0x1bc   :  { %v703_v39 = vpack.c.bf16 %v680_v46, %v679_v45  ;;  %v617_v52 = vadd.f32 %v1937_v42, %v616_v49  ;;  %v685_v61 = vmax.f32 %v625_v54, 0.0 }
 0x1bd   :  { %v1513_v51 = vpop.f32.mrf.mxu1 }
 0x1be   :  { %v628_v53 = vadd.f32 %v1513_v51, %v1937_v42  ;;  %1554 = vmatprep.mubr.bf16.mxu0 %v703_v39  ;;  %v683_v59 = vmax.f32 %v617_v52, 0.0 }
 0x1bf   :  { %v619_v55 = vpop.f32.mrf.mxu1  ;;  %1555 = vmatmul.mubr.bf16.gmra.mxu0 %v704_v50 }
 0x1c0   :  { %v620_v56 = vadd.f32 %v1937_v42, %v619_v55  ;;  %v686_v57 = vmax.f32 %v628_v53, 0.0 }
 0x1c1   :  { %v1516_v58 = vpop.f32.mrf.mxu1 }
 0x1c2   :  { %v684_v60 = vmax.f32 %v620_v56, 0.0  ;;  %v706_v0 = vpack.c.bf16 %v686_v57, %v685_v61  ;;  %v641_v4 = vadd.f32 %v1516_v58, %v1937_v42 }
 0x1c3   :  { %v632_v62 = vpop.f32.mrf.mxu1 }
 0x1c4   :  { %v705_v63 = vpack.c.bf16 %v684_v60, %v683_v59  ;;  %v633_v2 = vadd.f32 %v1937_v42, %v632_v62  ;;  %v689_v11 = vmax.f32 %v641_v4, 0.0 }
 0x1c5   :  { %v1517_v1 = vpop.f32.mrf.mxu1 }
 0x1c6   :  { %v644_v3 = vadd.f32 %v1517_v1, %v1937_v42  ;;  %1558 = vmatprep.mubr.bf16.mxu0 %v705_v63  ;;  %v687_v9 = vmax.f32 %v633_v2, 0.0 }
 0x1c7   :  { %v635_v5 = vpop.f32.mrf.mxu1  ;;  %1559 = vmatmul.mubr.bf16.gmra.mxu0 %v706_v0 }
 0x1c8   :  { %v636_v6 = vadd.f32 %v1937_v42, %v635_v5  ;;  %v690_v7 = vmax.f32 %v644_v3, 0.0 }
 0x1c9   :  { %v1520_v8 = vpop.f32.mrf.mxu1 }
 0x1ca   :  { %v688_v10 = vmax.f32 %v636_v6, 0.0  ;;  %v708_v14 = vpack.c.bf16 %v690_v7, %v689_v11  ;;  %v657_v18 = vadd.f32 %v1520_v8, %v1937_v42 }
 0x1cb   :  { %v648_v12 = vpop.f32.mrf.mxu1 }
 0x1cc   :  { %v707_v13 = vpack.c.bf16 %v688_v10, %v687_v9  ;;  %v649_v16 = vadd.f32 %v1937_v42, %v648_v12  ;;  %v693_v24 = vmax.f32 %v657_v18, 0.0 }
 0x1cd   :  { %v1521_v15 = vpop.f32.mrf.mxu1 }
 0x1ce   :  { %v660_v17 = vadd.f32 %v1521_v15, %v1937_v42  ;;  %1562 = vmatprep.mubr.bf16.mxu0 %v707_v13  ;;  %v691_v22 = vmax.f32 %v649_v16, 0.0 }
 0x1cf   :  { %v651_v19 = vpop.f32.mrf.mxu1  ;;  %1563 = vmatmul.mubr.bf16.gmra.mxu0 %v708_v14 }
 0x1d0   :  { %v652_v20 = vadd.f32 %v1937_v42, %v651_v19  ;;  %v694_v21 = vmax.f32 %v660_v17, 0.0  ;;  %v1657_v42 = vld [vmem:[%s2155_s3 + $0x8] ss:$12 sps:$4 sm:$0xff]  }
 0x1d1   :  { %1584 = vmatprep.subr.bf16.mxu0 %v1657_v42  ;;  %1625 = vmatprep.subr.bf16.mxu1 %v1657_v42 }
 0x1d2   :  { %v692_v23 = vmax.f32 %v652_v20, 0.0  ;;  %v710_v26 = vpack.c.bf16 %v694_v21, %v693_v24  ;;  %1585 = vmatpush3.bf16.msra.mxu0 %v1657_v42  ;;  %1633 = vmatpush3.bf16.msra.mxu1 %v1657_v42 }
 0x1d4   :  { %v709_v25 = vpack.c.bf16 %v692_v23, %v691_v22 }
 0x1d6   :  { %1566 = vmatprep.mubr.bf16.mxu0 %v709_v25 }
 0x1d7   :  { %1567 = vmatmul.mubr.bf16.gmra.mxu0 %v710_v26 }
 0x25f   :  { %v1540_v28 = vpop.f32.mrf.mxu0 }
 0x260   :  { %v825_v34 = vadd.f32 %v1540_v28, %v1986_v30 }
 0x261   :  { %v816_v29 = vpop.f32.mrf.mxu0 }
 0x262   :  { %v817_v32 = vadd.f32 %v1986_v30, %v816_v29  ;;  %v945_v41 = vmax.f32 %v825_v34, 0.0 }
 0x263   :  { %v1541_v31 = vpop.f32.mrf.mxu0 }
 0x264   :  { %v828_v33 = vadd.f32 %v1541_v31, %v1986_v30  ;;  %v943_v38 = vmax.f32 %v817_v32, 0.0 }
 0x265   :  { %v819_v35 = vpop.f32.mrf.mxu0 }
 0x266   :  { %v820_v48 = vadd.f32 %v1986_v30, %v819_v35  ;;  %v946_v36 = vmax.f32 %v828_v33, 0.0 }
 0x267   :  { %v1544_v37 = vpop.f32.mrf.mxu0 }
 0x268   :  { %v944_v40 = vmax.f32 %v820_v48, 0.0  ;;  %v976_v45 = vpack.c.bf16 %v946_v36, %v945_v41  ;;  %v841_v39 = vadd.f32 %v1544_v37, %v1986_v30 }
 0x269   :  { %v832_v43 = vpop.f32.mrf.mxu0 }
 0x26a   :  { %v975_v44 = vpack.c.bf16 %v944_v40, %v943_v38  ;;  %v833_v47 = vadd.f32 %v1986_v30, %v832_v43  ;;  %v949_v56 = vmax.f32 %v841_v39, 0.0 }
 0x26b   :  { %v1545_v46 = vpop.f32.mrf.mxu0 }
 0x26c   :  { %v844_v49 = vadd.f32 %v1545_v46, %v1986_v30  ;;  %1586 = vmatprep.mubr.bf16.mxu0 %v975_v44  ;;  %v947_v54 = vmax.f32 %v833_v47, 0.0 }
 0x26d   :  { %v835_v50 = vpop.f32.mrf.mxu0  ;;  %1587 = vmatmul.mubr.bf16.vlgmr.msra.gmra.mxu0 %v976_v45 }
 0x26e   :  { %v836_v51 = vadd.f32 %v1986_v30, %v835_v50  ;;  %v950_v52 = vmax.f32 %v844_v49, 0.0 }
 0x26f   :  { %v1548_v53 = vpop.f32.mrf.mxu0 }
 0x270   :  { %v948_v55 = vmax.f32 %v836_v51, 0.0  ;;  %v978_v59 = vpack.c.bf16 %v950_v52, %v949_v56  ;;  %v857_v63 = vadd.f32 %v1548_v53, %v1986_v30 }
 0x271   :  { %v848_v57 = vpop.f32.mrf.mxu0 }
 0x272   :  { %v977_v58 = vpack.c.bf16 %v948_v55, %v947_v54  ;;  %v849_v61 = vadd.f32 %v1986_v30, %v848_v57  ;;  %v953_v6 = vmax.f32 %v857_v63, 0.0 }
 0x273   :  { %v1549_v60 = vpop.f32.mrf.mxu0 }
 0x274   :  { %v860_v62 = vadd.f32 %v1549_v60, %v1986_v30  ;;  %1590 = vmatprep.mubr.bf16.mxu1 %v977_v58  ;;  %v951_v4 = vmax.f32 %v849_v61, 0.0 }
 0x275   :  { %v851_v0 = vpop.f32.mrf.mxu0  ;;  %1591 = vmatmul.mubr.bf16.vlgmr.msra.gmra.mxu1 %v978_v59 }
 0x276   :  { %v852_v1 = vadd.f32 %v1986_v30, %v851_v0  ;;  %v954_v2 = vmax.f32 %v860_v62, 0.0 }
 0x277   :  { %v1552_v3 = vpop.f32.mrf.mxu0 }
 0x278   :  { %v952_v5 = vmax.f32 %v852_v1, 0.0  ;;  %v980_v9 = vpack.c.bf16 %v954_v2, %v953_v6  ;;  %v873_v13 = vadd.f32 %v1552_v3, %v1986_v30 }
 0x279   :  { %v864_v7 = vpop.f32.mrf.mxu0 }
 0x27a   :  { %v979_v8 = vpack.c.bf16 %v952_v5, %v951_v4  ;;  %v865_v11 = vadd.f32 %v1986_v30, %v864_v7  ;;  %v957_v20 = vmax.f32 %v873_v13, 0.0 }
 0x27b   :  { %v1553_v10 = vpop.f32.mrf.mxu0 }
 0x27c   :  { %v876_v12 = vadd.f32 %v1553_v10, %v1986_v30  ;;  %1594 = vmatprep.mubr.bf16.mxu1 %v979_v8  ;;  %v955_v18 = vmax.f32 %v865_v11, 0.0 }
 0x27d   :  { %v867_v14 = vpop.f32.mrf.mxu0  ;;  %1595 = vmatmul.mubr.bf16.gmra.mxu1 %v980_v9 }
 0x27e   :  { %v868_v15 = vadd.f32 %v1986_v30, %v867_v14  ;;  %v958_v16 = vmax.f32 %v876_v12, 0.0 }
 0x27f   :  { %v1556_v17 = vpop.f32.mrf.mxu0 }
 0x280   :  { %v956_v19 = vmax.f32 %v868_v15, 0.0  ;;  %v982_v23 = vpack.c.bf16 %v958_v16, %v957_v20  ;;  %v889_v27 = vadd.f32 %v1556_v17, %v1986_v30  ;;  %v2023_v15 = vld [vmem:[%s2157_s4 + $0x2] ss:$0 sm:$0xff] }
 0x281   :  { %v880_v21 = vpop.f32.mrf.mxu0 }
 0x282   :  { %v981_v22 = vpack.c.bf16 %v956_v19, %v955_v18  ;;  %v881_v25 = vadd.f32 %v1986_v30, %v880_v21  ;;  %v961_v34 = vmax.f32 %v889_v27, 0.0 }
 0x283   :  { %v1557_v24 = vpop.f32.mrf.mxu0 }
 0x284   :  { %v892_v26 = vadd.f32 %v1557_v24, %v1986_v30  ;;  %1598 = vmatprep.mubr.bf16.mxu1 %v981_v22  ;;  %v959_v32 = vmax.f32 %v881_v25, 0.0 }
 0x285   :  { %v883_v42 = vpop.f32.mrf.mxu0  ;;  %1599 = vmatmul.mubr.bf16.gmra.mxu1 %v982_v23 }
 0x286   :  { %v884_v28 = vadd.f32 %v1986_v30, %v883_v42  ;;  %v962_v29 = vmax.f32 %v892_v26, 0.0 }
 0x287   :  { %v1560_v31 = vpop.f32.mrf.mxu0 }
 0x288   :  { %v960_v33 = vmax.f32 %v884_v28, 0.0  ;;  %v984_v36 = vpack.c.bf16 %v962_v29, %v961_v34  ;;  %v905_v41 = vadd.f32 %v1560_v31, %v1986_v30 }
 0x289   :  { %v896_v35 = vpop.f32.mrf.mxu0 }
 0x28a   :  { %v983_v48 = vpack.c.bf16 %v960_v33, %v959_v32  ;;  %v897_v38 = vadd.f32 %v1986_v30, %v896_v35  ;;  %v965_v39 = vmax.f32 %v905_v41, 0.0 }
 0x28b   :  { %v1561_v37 = vpop.f32.mrf.mxu0 }
 0x28c   :  { %v908_v40 = vadd.f32 %v1561_v37, %v1986_v30  ;;  %1602 = vmatprep.mubr.bf16.mxu1 %v983_v48  ;;  %v963_v47 = vmax.f32 %v897_v38, 0.0 }
 0x28d   :  { %v899_v43 = vpop.f32.mrf.mxu0  ;;  %1603 = vmatmul.mubr.bf16.gmra.mxu1 %v984_v36 }
 0x28e   :  { %v900_v44 = vadd.f32 %v1986_v30, %v899_v43  ;;  %v966_v45 = vmax.f32 %v908_v40, 0.0 }
 0x28f   :  { %v1564_v46 = vpop.f32.mrf.mxu0 }
 0x290   :  { %v964_v49 = vmax.f32 %v900_v44, 0.0  ;;  %v986_v52 = vpack.c.bf16 %v966_v45, %v965_v39  ;;  %v921_v56 = vadd.f32 %v1564_v46, %v1986_v30 }
 0x291   :  { %v912_v50 = vpop.f32.mrf.mxu0 }
 0x292   :  { %v985_v51 = vpack.c.bf16 %v964_v49, %v963_v47  ;;  %v913_v54 = vadd.f32 %v1986_v30, %v912_v50  ;;  %v969_v63 = vmax.f32 %v921_v56, 0.0 }
 0x293   :  { %v1565_v53 = vpop.f32.mrf.mxu0 }
 0x294   :  { %v924_v55 = vadd.f32 %v1565_v53, %v1986_v30  ;;  %1606 = vmatprep.mubr.bf16.mxu1 %v985_v51  ;;  %v967_v61 = vmax.f32 %v913_v54, 0.0 }
 0x295   :  { %v915_v57 = vpop.f32.mrf.mxu0  ;;  %1607 = vmatmul.mubr.bf16.gmra.mxu1 %v986_v52 }
 0x296   :  { %v916_v58 = vadd.f32 %v1986_v30, %v915_v57  ;;  %v970_v59 = vmax.f32 %v924_v55, 0.0 }
 0x297   :  { %v1568_v60 = vpop.f32.mrf.mxu0 }
 0x298   :  { %v968_v62 = vmax.f32 %v916_v58, 0.0  ;;  %v988_v2 = vpack.c.bf16 %v970_v59, %v969_v63  ;;  %v937_v6 = vadd.f32 %v1568_v60, %v1986_v30 }
 0x299   :  { %v928_v0 = vpop.f32.mrf.mxu0 }
 0x29a   :  { %v987_v1 = vpack.c.bf16 %v968_v62, %v967_v61  ;;  %v929_v4 = vadd.f32 %v1986_v30, %v928_v0  ;;  %v973_v12 = vmax.f32 %v937_v6, 0.0 }
 0x29b   :  { %v1569_v3 = vpop.f32.mrf.mxu0 }
 0x29c   :  { %v940_v5 = vadd.f32 %v1569_v3, %v1986_v30  ;;  %1610 = vmatprep.mubr.bf16.mxu1 %v987_v1  ;;  %v971_v10 = vmax.f32 %v929_v4, 0.0 }
 0x29d   :  { %v931_v7 = vpop.f32.mrf.mxu0  ;;  %1611 = vmatmul.mubr.bf16.gmra.mxu1 %v988_v2 }
 0x29e   :  { %v932_v8 = vadd.f32 %v1986_v30, %v931_v7  ;;  %v974_v9 = vmax.f32 %v940_v5, 0.0 }
 0x2a0   :  { %v972_v11 = vmax.f32 %v932_v8, 0.0  ;;  %v990_v14 = vpack.c.bf16 %v974_v9, %v973_v12 }
 0x2a2   :  { %v989_v13 = vpack.c.bf16 %v972_v11, %v971_v10 }
 0x2a4   :  { %1614 = vmatprep.mubr.bf16.mxu1 %v989_v13 }
 0x2a5   :  { %1615 = vmatmul.mubr.bf16.gmra.mxu1 %v990_v14 }
 0x32d   :  { %v1588_v16 = vpop.f32.mrf.mxu0 }
 0x32e   :  { %v1105_v17 = vadd.f32 %v1588_v16, %v2023_v15 }
 0x32f   :  { %v1096_v18 = vpop.f32.mrf.mxu0 }
 0x330   :  { %1225 = vst [vmem:[%s2158_s5 + $0x10] sm:$0xff] %v1105_v17  ;;  %v1097_v30 = vadd.f32 %v2023_v15, %v1096_v18 }
 0x331   :  { %v1589_v19 = vpop.f32.mrf.mxu0 }
 0x332   :  { %1223 = vst [vmem:[%s2158_s5] sm:$0xff] %v1097_v30  ;;  %v1108_v20 = vadd.f32 %v1589_v19, %v2023_v15 }
 0x333   :  { %v1099_v21 = vpop.f32.mrf.mxu0 }
 0x334   :  { %1226 = vst [vmem:[%s2158_s5 + $0x18] sm:$0xff] %v1108_v20  ;;  %v1100_v22 = vadd.f32 %v2023_v15, %v1099_v21 }
 0x335   :  { %v1592_v23 = vpop.f32.mrf.mxu1 }
 0x336   :  { %1224 = vst [vmem:[%s2158_s5 + $0x8] sm:$0xff] %v1100_v22  ;;  %v1121_v24 = vadd.f32 %v1592_v23, %v2023_v15 }
 0x337   :  { %v1112_v25 = vpop.f32.mrf.mxu1 }
 0x338   :  { %1229 = vst [vmem:[%s2158_s5 + $0x30] sm:$0xff] %v1121_v24  ;;  %v1113_v26 = vadd.f32 %v2023_v15, %v1112_v25 }
 0x339   :  { %v1593_v27 = vpop.f32.mrf.mxu1 }
 0x33a   :  { %1227 = vst [vmem:[%s2158_s5 + $0x20] sm:$0xff] %v1113_v26  ;;  %v1124_v42 = vadd.f32 %v1593_v27, %v2023_v15 }
 0x33b   :  { %v1115_v28 = vpop.f32.mrf.mxu1 }
 0x33c   :  { %1230 = vst [vmem:[%s2158_s5 + $0x38] sm:$0xff] %v1124_v42  ;;  %v1116_v29 = vadd.f32 %v2023_v15, %v1115_v28 }
 0x33d   :  { %v1596_v31 = vpop.f32.mrf.mxu1 }
 0x33e   :  { %1228 = vst [vmem:[%s2158_s5 + $0x28] sm:$0xff] %v1116_v29  ;;  %v1137_v32 = vadd.f32 %v1596_v31, %v2023_v15 }
 0x33f   :  { %v1128_v33 = vpop.f32.mrf.mxu1 }
 0x340   :  { %1233 = vst [vmem:[%s2158_s5 + $0x50] sm:$0xff] %v1137_v32  ;;  %v1129_v34 = vadd.f32 %v2023_v15, %v1128_v33 }
 0x341   :  { %v1597_v35 = vpop.f32.mrf.mxu1 }
 0x342   :  { %1231 = vst [vmem:[%s2158_s5 + $0x40] sm:$0xff] %v1129_v34  ;;  %v1140_v48 = vadd.f32 %v1597_v35, %v2023_v15 }
 0x343   :  { %v1131_v36 = vpop.f32.mrf.mxu1 }
 0x344   :  { %1234 = vst [vmem:[%s2158_s5 + $0x58] sm:$0xff] %v1140_v48  ;;  %v1132_v37 = vadd.f32 %v2023_v15, %v1131_v36 }
 0x345   :  { %v1600_v38 = vpop.f32.mrf.mxu1 }
 0x346   :  { %1232 = vst [vmem:[%s2158_s5 + $0x48] sm:$0xff] %v1132_v37  ;;  %v1153_v40 = vadd.f32 %v1600_v38, %v2023_v15 }
 0x347   :  { %v1144_v41 = vpop.f32.mrf.mxu1 }
 0x348   :  { %1237 = vst [vmem:[%s2158_s5 + $0x70] sm:$0xff] %v1153_v40  ;;  %v1145_v43 = vadd.f32 %v2023_v15, %v1144_v41 }
 0x349   :  { %v1601_v44 = vpop.f32.mrf.mxu1 }
 0x34a   :  { %1235 = vst [vmem:[%s2158_s5 + $0x60] sm:$0xff] %v1145_v43  ;;  %v1156_v45 = vadd.f32 %v1601_v44, %v2023_v15 }
 0x34b   :  { %v1147_v46 = vpop.f32.mrf.mxu1 }
 0x34c   :  { %1238 = vst [vmem:[%s2158_s5 + $0x78] sm:$0xff] %v1156_v45  ;;  %v1148_v47 = vadd.f32 %v2023_v15, %v1147_v46 }
 0x34d   :  { %v1604_v49 = vpop.f32.mrf.mxu1 }
 0x34e   :  { %1236 = vst [vmem:[%s2158_s5 + $0x68] sm:$0xff] %v1148_v47  ;;  %v1169_v39 = vadd.f32 %v1604_v49, %v2023_v15 }
 0x34f   :  { %v1160_v50 = vpop.f32.mrf.mxu1 }
 0x350   :  { %1241 = vst [vmem:[%s2158_s5 + $0x90] sm:$0xff] %v1169_v39  ;;  %v1161_v51 = vadd.f32 %v2023_v15, %v1160_v50 }
 0x351   :  { %v1605_v52 = vpop.f32.mrf.mxu1 }
 0x352   :  { %1239 = vst [vmem:[%s2158_s5 + $0x80] sm:$0xff] %v1161_v51  ;;  %v1172_v53 = vadd.f32 %v1605_v52, %v2023_v15 }
 0x353   :  { %v1163_v54 = vpop.f32.mrf.mxu1 }
 0x354   :  { %1242 = vst [vmem:[%s2158_s5 + $0x98] sm:$0xff] %v1172_v53  ;;  %v1164_v55 = vadd.f32 %v2023_v15, %v1163_v54 }
 0x355   :  { %v1608_v56 = vpop.f32.mrf.mxu1 }
 0x356   :  { %1240 = vst [vmem:[%s2158_s5 + $0x88] sm:$0xff] %v1164_v55  ;;  %v1185_v57 = vadd.f32 %v1608_v56, %v2023_v15 }
 0x357   :  { %v1176_v58 = vpop.f32.mrf.mxu1 }
 0x358   :  { %1245 = vst [vmem:[%s2158_s5 + $0xb0] sm:$0xff] %v1185_v57  ;;  %v1177_v59 = vadd.f32 %v2023_v15, %v1176_v58 }
 0x359   :  { %v1609_v60 = vpop.f32.mrf.mxu1 }
 0x35a   :  { %1243 = vst [vmem:[%s2158_s5 + $0xa0] sm:$0xff] %v1177_v59  ;;  %v1188_v61 = vadd.f32 %v1609_v60, %v2023_v15 }
 0x35b   :  { %v1179_v62 = vpop.f32.mrf.mxu1 }
 0x35c   :  { %1246 = vst [vmem:[%s2158_s5 + $0xb8] sm:$0xff] %v1188_v61  ;;  %v1180_v63 = vadd.f32 %v2023_v15, %v1179_v62 }
 0x35d   :  { %v1612_v0 = vpop.f32.mrf.mxu1 }
 0x35e   :  { %1244 = vst [vmem:[%s2158_s5 + $0xa8] sm:$0xff] %v1180_v63  ;;  %v1201_v1 = vadd.f32 %v1612_v0, %v2023_v15 }
 0x35f   :  { %v1192_v2 = vpop.f32.mrf.mxu1 }
 0x360   :  { %1249 = vst [vmem:[%s2158_s5 + $0xd0] sm:$0xff] %v1201_v1  ;;  %v1193_v3 = vadd.f32 %v2023_v15, %v1192_v2 }
 0x361   :  { %v1613_v4 = vpop.f32.mrf.mxu1 }
 0x362   :  { %1247 = vst [vmem:[%s2158_s5 + $0xc0] sm:$0xff] %v1193_v3  ;;  %v1204_v5 = vadd.f32 %v1613_v4, %v2023_v15 }
 0x363   :  { %v1195_v6 = vpop.f32.mrf.mxu1 }
 0x364   :  { %1250 = vst [vmem:[%s2158_s5 + $0xd8] sm:$0xff] %v1204_v5  ;;  %v1196_v7 = vadd.f32 %v2023_v15, %v1195_v6 }
 0x365   :  { %v1616_v8 = vpop.f32.mrf.mxu1 }
 0x366   :  { %1248 = vst [vmem:[%s2158_s5 + $0xc8] sm:$0xff] %v1196_v7  ;;  %v1217_v9 = vadd.f32 %v1616_v8, %v2023_v15 }
 0x367   :  { %v1208_v10 = vpop.f32.mrf.mxu1 }
 0x368   :  { %1253 = vst [vmem:[%s2158_s5 + $0xf0] sm:$0xff] %v1217_v9  ;;  %v1209_v11 = vadd.f32 %v2023_v15, %v1208_v10 }
 0x369   :  { %v1617_v12 = vpop.f32.mrf.mxu1 }
 0x36a   :  { %1251 = vst [vmem:[%s2158_s5 + $0xe0] sm:$0xff] %v1209_v11  ;;  %v1220_v13 = vadd.f32 %v1617_v12, %v2023_v15 }
 0x36b   :  { %v1211_v14 = vpop.f32.mrf.mxu1 }
 0x36c   :  { %1254 = vst [vmem:[%s2158_s5 + $0xf8] sm:$0xff] %v1220_v13  ;;  %v1212_v16 = vadd.f32 %v2023_v15, %v1211_v14 }
 0x36e   :  { %1252 = vst [vmem:[%s2158_s5 + $0xe8] sm:$0xff] %v1212_v16 }

</bundles_post_ra>
